<compile_context>
chip_gen: v5e
topology: v5e:2x2
jax: 0.10.0
libtpu: 0.0.40
codegen_flags: <defaults>
</compile_context>

<pallas_src>
import functools
import math

import jax
import jax.numpy as jnp
from jax.experimental import pallas as pl
from jax.experimental.pallas import tpu as pltpu


# ------------------------------ fused kernel ---------------------------------
def _point_embed_kernel(x_ref, basis_ref, w_sin_ref, w_cos_ref, w_xyz_ref,
                        b_ref, o_ref):
    x = x_ref[...].astype(jnp.float32)            # (tm, 3)
    basis = basis_ref[...]                        # (3, H2)
    w_xyz = w_xyz_ref[...]                        # (3, D)

    x0 = x[:, 0:1]
    x1 = x[:, 1:2]
    x2 = x[:, 2:3]

    # proj = x @ basis, computed on the VPU (K=3) -> exact f32, no MXU waste.
    proj = (x0 * basis[0:1, :]
            + x1 * basis[1:2, :]
            + x2 * basis[2:3, :])                 # (tm, H2)

    # Linear over the implicit concat [sin(proj), cos(proj), x] via weight slabs.
    y = jnp.dot(jnp.sin(proj), w_sin_ref[...],
                preferred_element_type=jnp.float32)
    y = y + jnp.dot(jnp.cos(proj), w_cos_ref[...],
                    preferred_element_type=jnp.float32)
    y = y + (x0 * w_xyz[0:1, :]
             + x1 * w_xyz[1:2, :]
             + x2 * w_xyz[2:3, :])
    o_ref[...] = (y + b_ref[...]).astype(o_ref.dtype)


# ------------------------------- wrapper --------------------------------------
def point_embed(x, params, *, block_m=512):
    """x: [B, N, 3] float -> [B, N, dim] (fused Fourier embed + Linear)."""
    B, N, C = x.shape
    assert C == 3
    basis = params["basis"]            # (3, H2)
    w_sin = params["w_sin"]            # (H2, D)
    w_cos = params["w_cos"]            # (H2, D)
    w_xyz = params["w_xyz"]            # (3,  D)
    b = params["b"]                    # (D,)
    H2 = basis.shape[1]
    D = w_sin.shape[1]

    M = B * N
    # Row-tile size: multiple of 8 (sublane), capped by block_m.
    tm = min(block_m, max(8, ((M + 7) // 8) * 8))
    M_pad = ((M + tm - 1) // tm) * tm

    x2 = x.reshape(M, 3).astype(jnp.float32)
    if M_pad != M:
        x2 = jnp.pad(x2, ((0, M_pad - M), (0, 0)))

    out = pl.pallas_call(
        _point_embed_kernel,
        out_shape=jax.ShapeDtypeStruct((M_pad, D), jnp.float32),
        grid=(M_pad // tm,),
        in_specs=[
            pl.BlockSpec((tm, 3), lambda i: (i, 0)),     # points (tiled over rows)
            pl.BlockSpec((3, H2), lambda i: (0, 0)),     # basis (resident)
            pl.BlockSpec((H2, D), lambda i: (0, 0)),     # W_sin (resident)
            pl.BlockSpec((H2, D), lambda i: (0, 0)),     # W_cos (resident)
            pl.BlockSpec((3, D), lambda i: (0, 0)),      # W_xyz (resident)
            pl.BlockSpec((1, D), lambda i: (0, 0)),      # bias  (resident)
        ],
        out_specs=pl.BlockSpec((tm, D), lambda i: (i, 0)),
        compiler_params=pltpu.CompilerParams(
            dimension_semantics=("parallel",)),
    )(x2, basis, w_sin, w_cos, w_xyz, b.reshape(1, D))

    return out[:M].reshape(B, N, D)


# ----------------------------- params init ------------------------------------
def init_params(key, hidden_dim=48, dim=128):
    assert hidden_dim % 6 == 0
    k6 = hidden_dim // 6
    H2 = hidden_dim // 2

    # basis exactly as in the PyTorch module (block-structured (3, H/2)).
    e = (2.0 ** jnp.arange(k6, dtype=jnp.float32)) * math.pi
    z = jnp.zeros((k6,), jnp.float32)
    basis = jnp.stack([
        jnp.concatenate([e, z, z]),
        jnp.concatenate([z, e, z]),
        jnp.concatenate([z, z, e]),
    ], axis=0)                                                   # (3, H2)

    # nn.Linear(H+3, dim) default init: U(-1/sqrt(fan_in), 1/sqrt(fan_in)).
    fan_in = hidden_dim + 3
    bound = 1.0 / math.sqrt(fan_in)
    kw, kb = jax.random.split(key)
    Wt = jax.random.uniform(kw, (fan_in, dim), jnp.float32, -bound, bound)
    b = jax.random.uniform(kb, (dim,), jnp.float32, -bound, bound)

    return dict(
        basis=basis,
        w_sin=Wt[:H2],               # rows of W.T matching sin(proj)
        w_cos=Wt[H2:2 * H2],         # rows matching cos(proj)
        w_xyz=Wt[2 * H2:],           # rows matching the raw xyz coords
        b=b,
        Wt=Wt,                       # full transposed weight, for the reference
    )


# ---------------------------- pure-JAX reference -------------------------------
def reference_forward(x, p):
    proj = jnp.einsum("bnd,de->bne", x, p["basis"],
                      precision=jax.lax.Precision.HIGHEST)
    emb = jnp.concatenate([jnp.sin(proj), jnp.cos(proj), x], axis=-1)
    return jnp.dot(emb, p["Wt"],
                   precision=jax.lax.Precision.HIGHEST) + p["b"]


# ----------------------------------- main --------------------------------------
if __name__ == "__main__":
    B, N = 2, 16                     # 2 batches of 16 points (xyz)
    HIDDEN_DIM, DIM = 48, 128

    key = jax.random.PRNGKey(0)
    kx, kp = jax.random.split(key)
    x = jax.random.normal(kx, (B, N, 3), jnp.float32)
    params = init_params(kp, HIDDEN_DIM, DIM)

    # Small block_m exercises a multi-step, pipelined grid even at toy sizes.
    fwd = jax.jit(functools.partial(point_embed, block_m=8))
    out = fwd(x, params)
    jax.block_until_ready(out)

    ref = reference_forward(x, params)
    assert out.shape == (B, N, DIM)
    err = float(jnp.max(jnp.abs(out - ref)))
    assert err < 5e-3, f"mismatch vs pure-JAX reference: {err}"

    print("KERNEL_OK")
</pallas_src>

<mosaic_0001>
module attributes {stable_mosaic.version = 11 : i64} {
  func.func @_point_embed_kernel(%arg0: i32, %arg1: memref<8x3xf32, #tpu.memory_space<vmem>>, %arg2: memref<3x24xf32, #tpu.memory_space<vmem>>, %arg3: memref<24x128xf32, #tpu.memory_space<vmem>>, %arg4: memref<24x128xf32, #tpu.memory_space<vmem>>, %arg5: memref<3x128xf32, #tpu.memory_space<vmem>>, %arg6: memref<1x128xf32, #tpu.memory_space<vmem>>, %arg7: memref<8x128xf32, #tpu.memory_space<vmem>>) attributes {dimension_semantics = [#tpu.dimension_semantics<parallel>], iteration_bounds = array<i64: 4>, scalar_prefetch = 0 : i64, scratch_operands = 0 : i64, tpu.core_type = #tpu.core_type<tc>, window_params = [{transform_indices = @transform_0, window_bounds = array<i64: 8, 3>}, {pipeline_mode = #tpu.pipeline_mode<synchronous>, transform_indices = @transform_1, window_bounds = array<i64: 3, 24>}, {pipeline_mode = #tpu.pipeline_mode<synchronous>, transform_indices = @transform_2, window_bounds = array<i64: 24, 128>}, {pipeline_mode = #tpu.pipeline_mode<synchronous>, transform_indices = @transform_3, window_bounds = array<i64: 24, 128>}, {pipeline_mode = #tpu.pipeline_mode<synchronous>, transform_indices = @transform_4, window_bounds = array<i64: 3, 128>}, {pipeline_mode = #tpu.pipeline_mode<synchronous>, transform_indices = @transform_5, window_bounds = array<i64: 1, 128>}, {transform_indices = @transform_6, window_bounds = array<i64: 8, 128>}]} {
    %c0 = arith.constant 0 : index
    %c0_0 = arith.constant 0 : index
    %0 = vector.load %arg1[%c0, %c0_0] : memref<8x3xf32, #tpu.memory_space<vmem>>, vector<8x3xf32>
    %c0_1 = arith.constant 0 : index
    %c0_2 = arith.constant 0 : index
    %1 = vector.load %arg2[%c0_1, %c0_2] : memref<3x24xf32, #tpu.memory_space<vmem>>, vector<3x24xf32>
    %c0_3 = arith.constant 0 : index
    %c0_4 = arith.constant 0 : index
    %2 = vector.load %arg5[%c0_3, %c0_4] : memref<3x128xf32, #tpu.memory_space<vmem>>, vector<3x128xf32>
    %3 = vector.extract_strided_slice %0 {offsets = [0, 0], sizes = [8, 1], strides = [1, 1]} : vector<8x3xf32> to vector<8x1xf32>
    %4 = vector.extract_strided_slice %0 {offsets = [0, 1], sizes = [8, 1], strides = [1, 1]} : vector<8x3xf32> to vector<8x1xf32>
    %5 = vector.extract_strided_slice %0 {offsets = [0, 2], sizes = [8, 1], strides = [1, 1]} : vector<8x3xf32> to vector<8x1xf32>
    %6 = vector.extract_strided_slice %1 {offsets = [0, 0], sizes = [1, 24], strides = [1, 1]} : vector<3x24xf32> to vector<1x24xf32>
    %7 = vector.broadcast %3 : vector<8x1xf32> to vector<8x24xf32>
    %8 = vector.broadcast %6 : vector<1x24xf32> to vector<8x24xf32>
    %9 = arith.mulf %7, %8 : vector<8x24xf32>
    %10 = vector.extract_strided_slice %1 {offsets = [1, 0], sizes = [1, 24], strides = [1, 1]} : vector<3x24xf32> to vector<1x24xf32>
    %11 = vector.broadcast %4 : vector<8x1xf32> to vector<8x24xf32>
    %12 = vector.broadcast %10 : vector<1x24xf32> to vector<8x24xf32>
    %13 = arith.mulf %11, %12 : vector<8x24xf32>
    %14 = arith.addf %9, %13 : vector<8x24xf32>
    %15 = vector.extract_strided_slice %1 {offsets = [2, 0], sizes = [1, 24], strides = [1, 1]} : vector<3x24xf32> to vector<1x24xf32>
    %16 = vector.broadcast %5 : vector<8x1xf32> to vector<8x24xf32>
    %17 = vector.broadcast %15 : vector<1x24xf32> to vector<8x24xf32>
    %18 = arith.mulf %16, %17 : vector<8x24xf32>
    %19 = arith.addf %14, %18 : vector<8x24xf32>
    %20 = math.sin %19 : vector<8x24xf32>
    %c0_5 = arith.constant 0 : index
    %c0_6 = arith.constant 0 : index
    %21 = vector.load %arg3[%c0_5, %c0_6] : memref<24x128xf32, #tpu.memory_space<vmem>>, vector<24x128xf32>
    %cst = arith.constant dense<0.000000e+00> : vector<8x128xf32>
    %22 = tpu.matmul %20, %21, %cst {dimension_numbers = #tpu.dot_dimension_numbers<[1], [0], [0], [1], [0, 0, 1, 1], [], []>} : vector<8x24xf32>, vector<24x128xf32>, vector<8x128xf32> -> vector<8x128xf32>
    %23 = math.cos %19 : vector<8x24xf32>
    %c0_7 = arith.constant 0 : index
    %c0_8 = arith.constant 0 : index
    %24 = vector.load %arg4[%c0_7, %c0_8] : memref<24x128xf32, #tpu.memory_space<vmem>>, vector<24x128xf32>
    %cst_9 = arith.constant dense<0.000000e+00> : vector<8x128xf32>
    %25 = tpu.matmul %23, %24, %cst_9 {dimension_numbers = #tpu.dot_dimension_numbers<[1], [0], [0], [1], [0, 0, 1, 1], [], []>} : vector<8x24xf32>, vector<24x128xf32>, vector<8x128xf32> -> vector<8x128xf32>
    %26 = arith.addf %22, %25 : vector<8x128xf32>
    %27 = vector.extract_strided_slice %2 {offsets = [0, 0], sizes = [1, 128], strides = [1, 1]} : vector<3x128xf32> to vector<1x128xf32>
    %28 = vector.broadcast %3 : vector<8x1xf32> to vector<8x128xf32>
    %29 = vector.broadcast %27 : vector<1x128xf32> to vector<8x128xf32>
    %30 = arith.mulf %28, %29 : vector<8x128xf32>
    %31 = vector.extract_strided_slice %2 {offsets = [1, 0], sizes = [1, 128], strides = [1, 1]} : vector<3x128xf32> to vector<1x128xf32>
    %32 = vector.broadcast %4 : vector<8x1xf32> to vector<8x128xf32>
    %33 = vector.broadcast %31 : vector<1x128xf32> to vector<8x128xf32>
    %34 = arith.mulf %32, %33 : vector<8x128xf32>
    %35 = arith.addf %30, %34 : vector<8x128xf32>
    %36 = vector.extract_strided_slice %2 {offsets = [2, 0], sizes = [1, 128], strides = [1, 1]} : vector<3x128xf32> to vector<1x128xf32>
    %37 = vector.broadcast %5 : vector<8x1xf32> to vector<8x128xf32>
    %38 = vector.broadcast %36 : vector<1x128xf32> to vector<8x128xf32>
    %39 = arith.mulf %37, %38 : vector<8x128xf32>
    %40 = arith.addf %35, %39 : vector<8x128xf32>
    %41 = arith.addf %26, %40 : vector<8x128xf32>
    %c0_10 = arith.constant 0 : index
    %c0_11 = arith.constant 0 : index
    %42 = vector.load %arg6[%c0_10, %c0_11] : memref<1x128xf32, #tpu.memory_space<vmem>>, vector<1x128xf32>
    %43 = vector.broadcast %42 : vector<1x128xf32> to vector<8x128xf32>
    %44 = arith.addf %41, %43 : vector<8x128xf32>
    %c0_12 = arith.constant 0 : index
    %c0_13 = arith.constant 0 : index
    %45 = vector.load %arg7[%c0_12, %c0_13] : memref<8x128xf32, #tpu.memory_space<vmem>>, vector<8x128xf32>
    tpu.vector_store %arg7[%c0_12, %c0_13], %44 {strides = array<i32>} : memref<8x128xf32, #tpu.memory_space<vmem>>, vector<8x128xf32>,
    return
  }
  func.func @transform_0(%arg0: i32) -> (i32, i32) {
    %c0_i32 = arith.constant 0 : i32
    %c0_i32_0 = arith.constant 0 : i32
    return %arg0, %c0_i32 : i32, i32
  }
  func.func @transform_1(%arg0: i32) -> (i32, i32) {
    %c0_i32 = arith.constant 0 : i32
    %c0_i32_0 = arith.constant 0 : i32
    %c0_i32_1 = arith.constant 0 : i32
    return %c0_i32, %c0_i32_0 : i32, i32
  }
  func.func @transform_2(%arg0: i32) -> (i32, i32) {
    %c0_i32 = arith.constant 0 : i32
    %c0_i32_0 = arith.constant 0 : i32
    %c0_i32_1 = arith.constant 0 : i32
    return %c0_i32, %c0_i32_0 : i32, i32
  }
  func.func @transform_3(%arg0: i32) -> (i32, i32) {
    %c0_i32 = arith.constant 0 : i32
    %c0_i32_0 = arith.constant 0 : i32
    %c0_i32_1 = arith.constant 0 : i32
    return %c0_i32, %c0_i32_0 : i32, i32
  }
  func.func @transform_4(%arg0: i32) -> (i32, i32) {
    %c0_i32 = arith.constant 0 : i32
    %c0_i32_0 = arith.constant 0 : i32
    %c0_i32_1 = arith.constant 0 : i32
    return %c0_i32, %c0_i32_0 : i32, i32
  }
  func.func @transform_5(%arg0: i32) -> (i32, i32) {
    %c0_i32 = arith.constant 0 : i32
    %c0_i32_0 = arith.constant 0 : i32
    %c0_i32_1 = arith.constant 0 : i32
    return %c0_i32, %c0_i32_0 : i32, i32
  }
  func.func @transform_6(%arg0: i32) -> (i32, i32) {
    %c0_i32 = arith.constant 0 : i32
    %c0_i32_0 = arith.constant 0 : i32
    return %arg0, %c0_i32 : i32, i32
  }
}

</mosaic_0001>

<bundles_post_ra>
// kernel: point_embed.1
= control target key start
LH: loop header
LB: loop body
LE: loop exit
PB: predicated region body
PF: predicated region fallthrough
CT: control target
= control target key end

     0   :  { %11 = vsyncpa [#allocation3], 0  ;;  %s1158_s0 = inlined_call_operand.vmem [shape: f32[32,3], index: 0, kind: input, shape index: {}]   ;;  %s1159_s1 = inlined_call_operand.vmem [shape: f32[3,24], index: 1, kind: input, shape index: {}]   ;;  %s1160_s2 = inlined_call_operand.vmem [shape: f32[24,128], index: 2, kind: input, shape index: {}]   ;;  %s1161_s3 = inlined_call_operand.hbm [shape: f32[24,128], index: 3, kind: input, shape index: {}]   ;;  %s1162_s4 = inlined_call_operand.vmem [shape: f32[3,128], index: 4, kind: input, shape index: {}]   ;;  %s1163_s5 = inlined_call_operand.vmem [shape: f32[1,128], index: 5, kind: input, shape index: {}]   ;;  %s1164_s6 = inlined_call_operand.hbm [shape: f32[32,128], index: 6, kind: output, shape index: {}]  }
   0x1   :  { %12 = vsyncpa [#allocation4], 0 }
   0x2   :  { %14 = vsyncpa [#allocation4 + $0x1], 0  ;;  %s983_s21 = smov 0   ;;  %s985_s22 = smov 0  }
   0x3   :  { %s987_s23 = smov 0   ;;  %s989_s24 = smov 0  }
   0x4 LB: > { %s1004_s25 = sadd.s32 4294967295, %s934_s24   ;;  %s752_s26 = sadd.s32 4294967294, %s934_s24   ;;  %s934_s24 = sphi %s989_s24, %s1170_s24   ;;  %s930_s23 = sphi %s987_s23, %s1169_s23   ;;  %s926_s22 = sphi %s985_s22, %s1168_s22   ;;  %s922_s21 = sphi %s983_s21, %s1167_s21  }
   0x5   : > { %s1008_s27 = sadd.s32 1, %s934_s24   ;;  %s158_s28 = sadd.s32 1, %s930_s23 }
   0x6   : > { %s155_s29 = ssub.s32 %s934_s24, %s1008_s27  ;;  %p168_p0 = scmp.ne.s32.totalorder %s930_s23, %s926_s22 }
   0x7   : > { %p156_p1 = scmp.eq.s32.totalorder %s155_s29, 0  ;;  %p169_p2 = scmp.eq.s32.totalorder %s1004_s25, 3 }
   0x8   : > { %p174_p3 = scmp.ne.s32.totalorder %s926_s22, %s922_s21  ;;  %p175_p4 = scmp.eq.s32.totalorder %s752_s26, 3 }
   0x9   : > { %s1019_s30 = scalar_select %p156_p1, %s930_s23, %s158_s28  }
   0xa   : > { %p1021_p5 = por %p169_p2, %p168_p0  ;;  %p1025_p6 = por %p175_p4, %p174_p3 }
   0xb   : > { %p753_p7 = scmp.ge.s32.totalorder %s934_s24, 1  ;;  %p182_p8 = scmp.lt.s32.totalorder %s934_s24, 5 }
   0xc   : > { %p786_p9 = scmp.eq.s32.totalorder %s1004_s25, 0  ;;  %s199_s11 = sshll.u32 %s1161_s3, 4  ;;  %s200_s11 = int_to_ptr.hbm [resolvable:$true] %s199_s11 }
   0xd   : > { %p183_p10 = pnand %p753_p7, %p182_p8  ;;  %s936_s12 = smov [#allocation2]  }
   0xe   : > { %s201_s13 = sshll.u32 %s936_s12, 4  ;;  %s937_s14 = smov 128   ;;  %s202_s13 = int_to_ptr.vmem [resolvable:$true] %s201_s13 }
   0xf   : > { %p778_p11 = pneg %p183_p10  ;;  %s938_s15 = smov 8  }
  0x10   : > { %230 = sbr.rel (%p183_p10) target bundleno = 390 (0x186), region = 44 }
  0x11   : > { %p779_p12 = pnand %p786_p9, %p778_p11 }
  0x13   : > { %781 = dma.hbm_to_vmem [thread:$0]  (!%p779_p12), %s200_s11, 384, %s202_s13, [#allocation3], %s937_s14, %s937_s14, %s938_s15  }
  0x15   : > { %913 = dma.done.wait (%p786_p9), [#allocation3], 384  }
  0x16   : > { %915 = vsyncadd (%p786_p9), [#allocation3], 4294966912  ;;  %p260_p13 = scmp.lt.s32.totalorder %s1004_s25, 3  ;;  %v939_v0 = vmov 0   ;;  %v940_v1 = vmov 2   ;;  %v941_v3 = vmov 1  }
  0x17   : > { %833 = vset.pattern.permute.xlu0 %v939_v0  ;;  %835 = vset.pattern.permute.xlu1 %v940_v1  ;;  %v265_v5 = vld [vmem:[%s1159_s1] sm:$0x7]  ;;  %v602_v7 = vld [vmem:[#allocation2 + $0x10] sm:$0xff]  ;;  %v601_v9 = vld [vmem:[#allocation2 + $0x8] sm:$0xff]  ;;  %v942_v42 = vmov 2102212464  }
  0x18   : > { %s261_s16 = scalar_select %p260_p13, %s1004_s25, 3  ;;  %v266_v6 = vld [vmem:[%s1162_s4] sm:$0x7]  ;;  %v445_v8 = vld [vmem:[%s1160_s2 + $0x10] sm:$0xff]  ;;  %620 = vmatpush.msra.mxu0 %v602_v7  ;;  %v444_v10 = vld [vmem:[%s1160_s2 + $0x8] sm:$0xff]  ;;  %v272_v13 = vperm.slane %v265_v5, 0 }
  0x19   : > { %643 = vmatpush.msra.mxu1 %v445_v8  ;;  %v600_v11 = vld [vmem:[#allocation2] sm:$0xff]  ;;  %v650_v14 = vperm.slane %v266_v6, 0  ;;  %v278_v15 = vperm.slane %v265_v5, 1  ;;  %v652_v16 = vperm.slane %v266_v6, 1  ;;  %v285_v17 = vperm.slane %v265_v5, 2  ;;  %s769_s18 = sshll.u32 %s1004_s25, 3 }
  0x1a   : > { %s759_s17 = sshll.u32 %s261_s16, 3  ;;  %v443_v12 = vld [vmem:[%s1160_s2] sm:$0xff]  ;;  %621 = vmatpush.msra.mxu0 %v601_v9  ;;  %v655_v18 = vperm.slane %v266_v6, 2  ;;  %v943_v44 = vmov 920167782   ;;  %s257_s16 = sand.u32 1, %s926_s22  }
  0x1b   : > { %s263_s20 = scalar_lea.vmem %s1158_s0, %s759_s17  ;;  %644 = vmatpush.msra.mxu1 %v444_v10  ;;  %v944_v47 = vmov 1326507024   ;;  %v945_v49 = vmov 683565275   ;;  %v946_v51 = vmov 2475754826   ;;  %s676_s26 = scalar_lea.hbm %s1164_s6, %s769_s18 }
  0x1c   : > { %v264_v2 = vld [vmem:[%s263_s20] sm:$0xff]  ;;  %622 = vmatpush.msra.mxu0 %v600_v11  ;;  %v947_v54 = vmov 2131351028   ;;  %s758_s17 = sshll.u32 %s257_s16, 3  ;;  %s680_s11 = sshll.u32 %s676_s26, 4  ;;  %s681_s11 = int_to_ptr.hbm [resolvable:$true] %s680_s11 }
  0x1d   : > { %269 = vperm.xlu0 %833, %v264_v2   ;;  %282 = vperm.xlu1 %835, %v264_v2   ;;  %s259_s9 = scalar_lea.vmem [#allocation5], %s758_s17  ;;  %s666_s25 = scalar_lea.sflag [#allocation4], %s257_s16 }
  0x1e   : > { %645 = vmatpush.msra.mxu1 %v443_v12  ;;  %s678_s10 = sshll.u32 %s259_s9, 4  ;;  %s882_s12 = sshra.s32 %s681_s11, 4  ;;  %s679_s10 = int_to_ptr.vmem [resolvable:$true] %s678_s10  ;;  %s883_s12 = int_to_ptr.hbm [resolvable:$true] %s882_s12 }
  0x1f   : > { %s884_s13 = scalar_lea.hbm %s883_s12, 8  ;;  %s888_s17 = scalar_lea.hbm %s1164_s6, 32 }
  0x20   : > { %p885_p0 = scmp.ne.s32.totalorder %s883_s12, %s884_s13  ;;  %p889_p3 = scmp.lt.s32.totalorder %s883_s12, %s1164_s6 }
  0x21   : > { %p890_p4 = scmp.lt.s32.totalorder %s888_s17, %s884_s13 }
  0x22   : > { %p886_p1 = pnand %p885_p0, %p1021_p5 }
  0x23   : > { %p891_p7 = por %p890_p4, %p889_p3 }
  0x24   : > { %p887_p2 = pneg %p886_p1 }
  0x25   : > { %834 = vset.pattern.permute.xlu0 %v941_v3 }
  0x26   : > { %275 = vperm.xlu0 %834, %v264_v2   ;;  %p892_p8 = pnand %p891_p7, %p887_p2 }
  0x2e   : > { %836 = vset.pattern.permute.xlu0 %v940_v1 }
  0x8f   : > { %v270_v4 = vpop.permute.xlu0 %269  ;;  %v283_v19 = vpop.permute.xlu1 %282 }
  0x90   : > { %v273_v20 = vmul.f32 %v272_v13, %v270_v4  ;;  %v651_v21 = vmul.f32 %v650_v14, %v270_v4  ;;  %v286_v25 = vmul.f32 %v285_v17, %v283_v19  ;;  %v656_v26 = vmul.f32 %v655_v18, %v283_v19 }
  0x98   : > { %v276_v22 = vpop.permute.xlu0 %275 }
  0x99   : > { %v279_v23 = vmul.f32 %v278_v15, %v276_v22  ;;  %v653_v24 = vmul.f32 %v652_v16, %v276_v22 }
  0x9b   : > { %v280_v27 = vadd.f32 %v279_v23, %v273_v20  ;;  %v654_v28 = vadd.f32 %v653_v24, %v651_v21 }
  0x9d   : > { %v1062_v29 = vadd.f32 %v286_v25, %v280_v27  ;;  %v1064_v30 = vadd.f32 %v656_v26, %v654_v28 }
  0x9f   : > { %v291_v31 = vand.u32 2139095040, %v1062_v29  ;;  %v288_v34 = vand.u32 2147483647, %v1062_v29  ;;  %vm290_vm12 = vcmp.lt.s32.totalorder %v1062_v29, 0 }
  0xa1   : > { %v292_v32 = vshrl.u32 %v291_v31, 23  ;;  %v295_v36 = vand.u32 8388607, %v288_v34  ;;  %vm289_vm13 = vcmp.le.f32.partialorder %v288_v34, 0.7853982 }
  0xa3   : > { %v760_v33 = vadd.s32 4294967169, %v292_v32  ;;  %v296_v40 = vor.u32 8388608, %v295_v36 }
  0xa5   : > { %v298_v35 = vadd.s32 1, %v760_v33  ;;  %v1079_v61 = vshll.u32 %v296_v40, 8 }
  0xa7   : > { %vm299_vm0 = vcmp.gt.s32.totalorder %v298_v35, 0  ;;  %v337_v8 = vand.u32 65535, %v1079_v61  ;;  %v338_v10 = vshrl.u32 %v1079_v61, 16 }
  0xa8   : > { %v300_v37 = vsel %vm299_vm0, %v298_v35, 0 }
  0xa9   : > { %v302_v38 = vand.u32 31, %v300_v37  ;;  %v1072_v41 = vshrl.u32 %v300_v37, 5 }
  0xab   : > { %v1070_v39 = vsub.s32 32, %v302_v38  ;;  %v314_v43 = vshll.u32 %v942_v42, %v302_v38  ;;  %v317_v45 = vshll.u32 %v943_v44, %v302_v38  ;;  %v305_v50 = vshll.u32 %v945_v49, %v302_v38 }
  0xac   : > { %v308_v53 = vshll.u32 %v946_v51, %v302_v38  ;;  %v311_v56 = vshll.u32 %v947_v54, %v302_v38  ;;  %vm323_vm1 = vcmp.lt.s32.totalorder %v1072_v41, 4  ;;  %vm320_vm2 = vcmp.lt.s32.totalorder %v1072_v41, 1 }
  0xad   : > { %v315_v46 = vshrl.u32 %v943_v44, %v1070_v39  ;;  %v318_v48 = vshrl.u32 %v944_v47, %v1070_v39  ;;  %v306_v52 = vshrl.u32 %v946_v51, %v1070_v39  ;;  %v309_v55 = vshrl.u32 %v947_v54, %v1070_v39 }
  0xae   : > { %v312_v57 = vshrl.u32 %v942_v42, %v1070_v39  ;;  %vm322_vm3 = vcmp.lt.s32.totalorder %v1072_v41, 3  ;;  %vm321_vm4 = vcmp.lt.s32.totalorder %v1072_v41, 2  ;;  %v304_v36 = vshrl.u32 %v945_v49, %v1070_v39 }
  0xaf   : > { %v316_v58 = vor.u32 %v315_v46, %v314_v43  ;;  %v319_v59 = vor.u32 %v318_v48, %v317_v45  ;;  %v307_v60 = vor.u32 %v306_v52, %v305_v50  ;;  %v310_v62 = vor.u32 %v309_v55, %v308_v53 }
  0xb0   : > { %v313_v63 = vor.u32 %v312_v57, %v311_v56 }
  0xb1   : > { %v329_v1 = vsel %vm323_vm1, %v316_v58, 920167782  ;;  %v333_v2 = vsel %vm323_vm1, %v319_v59, 1326507024  ;;  %v328_v3 = vsel %vm320_vm2, %v307_v60, %v310_v62  ;;  %v324_v44 = vsel %vm320_vm2, %v304_v36, %v307_v60 }
  0xb2   : > { %v330_v4 = vsel %vm322_vm3, %v313_v63, %v329_v1  ;;  %v332_v5 = vsel %vm320_vm2, %v310_v62, %v313_v63  ;;  %v334_v7 = vsel %vm322_vm3, %v316_v58, %v333_v2  ;;  %v325_v32 = vsel %vm323_vm1, %v313_v63, 2102212464 }
  0xb3   : > { %v331_v6 = vsel %vm321_vm4, %v328_v3, %v330_v4  ;;  %v335_v9 = vsel %vm321_vm4, %v332_v5, %v334_v7  ;;  %v326_v45 = vsel %vm322_vm3, %v310_v62, %v325_v32  ;;  %vm603_vm1 = vcmask 195584  }
  0xb4   : > { %v361_v11 = vand.u32 65535, %v331_v6  ;;  %v362_v12 = vshrl.u32 %v331_v6, 16  ;;  %v339_v13 = vand.u32 65535, %v335_v9  ;;  %v340_v14 = vshrl.u32 %v335_v9, 16 }
  0xb5   : > { %v327_v49 = vsel %vm321_vm4, %v324_v44, %v326_v45 }
  0xb6   : > { %v364_v15 = vmul.u32 %v362_v12, %v337_v8  ;;  %v365_v16 = vmul.u32 %v361_v11, %v338_v10  ;;  %v342_v17 = vmul.u32 %v340_v14, %v337_v8  ;;  %v343_v18 = vmul.u32 %v339_v13, %v338_v10 }
  0xb7   : > { %v363_v19 = vmul.u32 %v361_v11, %v337_v8  ;;  %v341_v21 = vmul.u32 %v339_v13, %v337_v8  ;;  %v366_v23 = vmul.u32 %v362_v12, %v338_v10  ;;  %v344_v24 = vmul.u32 %v340_v14, %v338_v10 }
  0xb8   : > { %v367_v20 = vshll.u32 %v364_v15, 16  ;;  %v345_v22 = vshll.u32 %v342_v17, 16  ;;  %v369_v25 = vshll.u32 %v365_v16, 16  ;;  %v347_v27 = vshll.u32 %v343_v18, 16 }
  0xb9   : > { %v368_v42 = vshrl.u32 %v364_v15, 16  ;;  %v346_v46 = vshrl.u32 %v342_v17, 16  ;;  %v370_v48 = vshrl.u32 %v365_v16, 16  ;;  %v348_v51 = vshrl.u32 %v343_v18, 16 }
  0xba   : > { %vm371_vm5 = vc.u32 %v363_v19, %v367_v20  ;;  %v373_v26 = vadd.s32 %v367_v20, %v363_v19  ;;  %vm349_vm6 = vc.u32 %v341_v21, %v345_v22  ;;  %v351_v28 = vadd.s32 %v345_v22, %v341_v21 }
  0xbb   : > { %v372_v31 = vsel %vm371_vm5, 1, %v939_v0  ;;  %v350_v33 = vsel %vm349_vm6, 1, %v939_v0  ;;  %v381_v55 = vmul.u32 %v1079_v61, %v327_v49  ;;  %vm431_vm5 = vweird.f32 %v1062_v29 }
  0xbc   : > { %v374_v35 = vadd.s32 %v372_v31, %v366_v23  ;;  %vm375_vm7 = vc.u32 %v373_v26, %v369_v25  ;;  %v352_v37 = vadd.s32 %v350_v33, %v344_v24  ;;  %vm353_vm8 = vc.u32 %v351_v28, %v347_v27 }
  0xbd   : > { %v376_v38 = vsel %vm375_vm7, 1, %v939_v0  ;;  %v354_v40 = vsel %vm353_vm8, 1, %v939_v0  ;;  %v377_v0 = vadd.s32 %v373_v26, %v369_v25 }
  0xbe   : > { %v378_v43 = vadd.s32 %v376_v38, %v374_v35  ;;  %v356_v47 = vadd.s32 %v354_v40, %v352_v37 }
  0xc0   : > { %v379_v50 = vadd.s32 %v378_v43, %v368_v42  ;;  %v357_v39 = vadd.s32 %v356_v47, %v346_v46 }
  0xc2   : > { %v380_v52 = vadd.s32 %v379_v50, %v370_v48  ;;  %v358_v53 = vadd.s32 %v357_v39, %v348_v51 }
  0xc4   : > { %v384_v54 = vadd.s32 1, %v380_v52  ;;  %vm383_vm9 = vc.u32 %v358_v53, %v377_v0  ;;  %v382_v4 = vadd.s32 %v377_v0, %v358_v53 }
  0xc6   : > { %v385_v56 = vsel %vm383_vm9, %v384_v54, %v380_v52 }
  0xc7   : > { %v386_v57 = vadd.s32 %v385_v56, %v381_v55 }
  0xc9   : > { %v387_v58 = vadd.s32 536870912, %v386_v57 }
  0xcb   : > { %v388_v59 = vshrl.u32 %v387_v58, 30 }
  0xcd   : > { %v389_v60 = vshll.u32 %v388_v59, 30  ;;  %v412_v17 = vsub.s32 4, %v388_v59 }
  0xcf   : > { %v390_v62 = vsub.s32 %v386_v57, %v389_v60  ;;  %v413_v22 = vsel %vm290_vm12, %v412_v17, %v388_v59 }
  0xd0   : > { %v415_v25 = vsel %vm289_vm13, 0, %v413_v22 }
  0xd1   : > { %vm391_vm10 = vcmp.lt.s32.totalorder %v390_v62, 0  ;;  %v392_v63 = vsub.s32 0, %v390_v62  ;;  %v432_v32 = vadd.s32 3, %v415_v25  ;;  %v590_v37 = vand.u32 3, %v415_v25 }
  0xd3   : > { %v393_v1 = vsel %vm391_vm10, %v392_v63, %v390_v62  ;;  %v433_v38 = vand.u32 3, %v432_v32  ;;  %vm591_vm14 = vcmp.lt.s32.totalorder %v590_v37, 2  ;;  %vm592_vm15 = vcmp.eq.s32.totalorder %v590_v37, 0 }
  0xd4   : > { %v394_v2 = vclz %v393_v1  ;;  %vm595_vm0 = vcmp.eq.s32.totalorder %v590_v37, 2 }
  0xd5   : > { %vm434_vm2 = vcmp.lt.s32.totalorder %v433_v38, 2  ;;  %vm435_vm3 = vcmp.eq.s32.totalorder %v433_v38, 0  ;;  %vm438_vm4 = vcmp.eq.s32.totalorder %v433_v38, 2 }
  0xd6   : > { %v761_v3 = vadd.s32 4294967294, %v394_v2 }
  0xd8   : > { %vm762_vm11 = vcmp.lt.s32.totalorder %v761_v3, 0 }
  0xd9   : > { %v397_v41 = vsel %vm762_vm11, 0, %v761_v3 }
  0xda   : > { %v398_v5 = vsub.s32 32, %v397_v41  ;;  %v402_v6 = vsub.s32 4294967266, %v397_v41  ;;  %v399_v7 = vshll.u32 %v390_v62, %v397_v41 }
  0xdc   : > { %v400_v8 = vshrl.u32 %v382_v4, %v398_v5  ;;  %v403_v61 = vadd.s32 127, %v402_v6 }
  0xde   : > { %v401_v9 = vor.u32 %v400_v8, %v399_v7  ;;  %v404_v10 = vshll.u32 %v403_v61, 23 }
  0xe0   : > { %v405_v11 = vor.u32 4788187, %v404_v10  ;;  %v408_v13 = vcvt.s32.f32 %v401_v9 }
  0xe2   : > { %v406_v12 = vand.u32 2147483647, %v405_v11 }
  0xe4   : > { %v409_v14 = vmul.f32 %v408_v13, %v406_v12 }
  0xe6   : > { %v410_v15 = vxor.u32 2147483648, %v409_v14 }
  0xe8   : > { %v411_v16 = vsel %vm290_vm12, %v410_v15, %v409_v14 }
  0xe9   : > { %v414_v18 = vsel %vm289_vm13, %v1062_v29, %v411_v16  ;;  %v837_v29 = vld [vmem:[%s1163_s5] ss:$0 sm:$0xff] }
  0xea   : > { %v416_v19 = vmul.f32 %v414_v18, %v414_v18 }
  0xec   : > { %v417_v20 = vmul.f32 -0.001358992, %v416_v19  ;;  %v424_v21 = vmul.f32 -0.00019511016, %v416_v19 }
  0xee   : > { %v418_v23 = vadd.f32 0.041655596, %v417_v20  ;;  %v425_v24 = vadd.f32 0.008332121, %v424_v21 }
  0xf0   : > { %v419_v26 = vmul.f32 %v418_v23, %v416_v19  ;;  %v426_v27 = vmul.f32 %v425_v24, %v416_v19 }
  0xf2   : > { %v420_v28 = vadd.f32 -0.4999988, %v419_v26  ;;  %v427_v31 = vadd.f32 -0.16666654, %v426_v27 }
  0xf4   : > { %v421_v33 = vmul.f32 %v420_v28, %v416_v19  ;;  %v428_v35 = vmul.f32 %v427_v31, %v416_v19 }
  0xf6   : > { %v422_v36 = vadd.f32 1.0, %v421_v33  ;;  %v429_v34 = vadd.f32 1.0, %v428_v35 }
  0xf8   : > { %v430_v40 = vmul.f32 %v429_v34, %v414_v18  ;;  %v439_v42 = vxor.u32 2147483648, %v422_v36 }
  0xfa   : > { %v436_v43 = vxor.u32 2147483648, %v430_v40  ;;  %v597_v45 = vsel %vm595_vm0, %v439_v42, %v430_v40  ;;  %v440_v47 = vsel %vm438_vm4, %v439_v42, %v430_v40 }
  0xfc   : > { %v594_v44 = vsel %vm592_vm15, %v422_v36, %v436_v43  ;;  %v437_v46 = vsel %vm435_vm3, %v422_v36, %v436_v43 }
  0xfd   : > { %v598_v48 = vsel %vm591_vm14, %v594_v44, %v597_v45  ;;  %v441_v50 = vsel %vm434_vm2, %v437_v46, %v440_v47 }
  0xfe   : > { %v599_v51 = vsel %vm431_vm5, nan, %v598_v48  ;;  %v442_v39 = vsel %vm431_vm5, nan, %v441_v50 }
  0xff   : > { %766 = vmatmul.msk.f32.vlgmr.msra.gmra.mxu0 %vm603_vm1, %v599_v51  ;;  %767 = vmatmul.msk.f32.vlgmr.msra.gmra.mxu1 %vm603_vm1, %v442_v39 }
 0x17c   : > { %v624_v49 = vpop.f32.mrf.mxu0  ;;  %v647_v52 = vpop.f32.mrf.mxu1 }
 0x17d   : > { %v648_v53 = vadd.f32 %v647_v52, %v624_v49 }
 0x17f   : > { %v658_v0 = vadd.f32 %v1064_v30, %v648_v53 }
 0x181   : > { %v663_v54 = vadd.f32 %v837_v29, %v658_v0 }
 0x183   : > { %664 = vst [vmem:[%s259_s9] sm:$0xff] %v663_v54 }
 0x184   : > { %895 = shalt.err (!%p892_p8)
}
 0x185   : > { %776 = dma.vmem_to_hbm [thread:$0]  (%p1021_p5), %s679_s10, 128, %s681_s11, %s666_s25  }
 0x186 PF: > { %p788_p9 = scmp.ge.s32.totalorder %s934_s24, 2  ;;  %s692_s16 = sand.u32 1, %s922_s21  }
 0x187   : > { %s693_s20 = scalar_lea.sflag [#allocation4], %s692_s16 }
 0x188   : > { %p783_p10 = pnand %p788_p9, %p1025_p6 }
 0x18a   : > { %p784_p11 = pneg %p783_p10 }
 0x18c   : > { %917 = dma.done.wait (%p784_p11), %s693_s20, 128  }
 0x18d   : > { %919 = vsyncadd (%p784_p11), %s693_s20, 4294967168  ;;  %p17_p12 = scmp.ge.s32.totalorder %s1008_s27, 6   ;;  %s1167_s21 = smov %s926_s22 }
 0x18e   : > { %s1168_s22 = smov %s930_s23  ;;  %s1169_s23 = smov %s1019_s30 }
 0x18f   : > { %s1170_s24 = smov %s1008_s27  ;;  %19 = sbr.rel (!%p17_p12) target bundleno = 4 (0x4), region = 84 }
 0x194   :  { %699 = vsyncpa [#allocation3], 1 }
 0x195   :  { %701 = vsyncpa [#allocation3 + $0x1], 1 }
 0x196   :  { %702 = vsyncpa [#allocation4], 1 }
 0x197   :  { %704 = vsyncpa [#allocation4 + $0x1], 1 }

</bundles_post_ra>
